<compile_context>
chip_gen: v7x
topology: tpu7x:2x2x1
jax: 0.10.0
libtpu: 0.0.40
codegen_flags: <defaults>
</compile_context>

<pallas_src>
import functools

import jax
import jax.numpy as jnp
from jax.experimental import pallas as pl
from jax.experimental.pallas import tpu as pltpu

EPSILON = 0.2  # module-level `epsilon` in the reference script


def _eps_lstm_kernel(
    x_ref,       # VMEM (S*B, I)   : input sequence, flattened over (S, B)
    wh_ref,      # VMEM (H, 4H)    : recurrent weights, gates packed [f|i|o|c]
    wx_ref,      # VMEM (I, 4H)    : input weights
    b_ref,       # VMEM (1, 4H)    : packed bias
    keep_ref,    # VMEM (S*B, 4H)  : 1 - eps_mask  (c_hat lanes == 1)
    rand_ref,    # VMEM (S*B, 4H)  : eps_mask * replacement noise (c lanes == 0)
    out_ref,     # VMEM (S+1, B, H): rows 0..S-1 = h_t, row S = c_T
    *,
    seq_len,
    batch,
    hidden,
):
    S, B, H = seq_len, batch, hidden
    G = 4 * H

    # ---- hoisted, loop-invariant work --------------------------------------
    w_h = wh_ref[...]                                    # (H, 4H), vreg-resident
    # All x contributions at once (single MXU dot), bias folded in.
    x_proj = (
        jnp.dot(x_ref[...], wx_ref[...], preferred_element_type=jnp.float32)
        + b_ref[...]
    )                                                    # (S*B, 4H)
    keep = keep_ref[...]                                 # (S*B, 4H)
    rterm = rand_ref[...]                                # (S*B, 4H)

    lane = jax.lax.broadcasted_iota(jnp.int32, (B, G), 1)
    sig_lanes = lane < 3 * H                             # f/i/o -> sigmoid, c_hat -> tanh

    h = jnp.zeros((B, H), jnp.float32)
    c = jnp.zeros((B, H), jnp.float32)
    hs = []

    # ---- serial recurrence (static unroll; S is tiny) ----------------------
    for t in range(S):
        r0 = t * B
        gates = x_proj[r0:r0 + B, :]                     # (B, 4H) precomputed row

        # Recurrent projection with K = H = 2: VPU broadcast-mul-add, no MXU.
        for k in range(H):
            gates = gates + h[:, k:k + 1] * w_h[k:k + 1, :]

        # Fused non-linearities: one sigmoid + one tanh pass over the packed vreg.
        act = jnp.where(sig_lanes, jax.nn.sigmoid(gates), jnp.tanh(gates))

        # Fused epsilon-greedy blend (exact for a {0,1} mask); c_hat untouched.
        act = act * keep[r0:r0 + B, :] + rterm[r0:r0 + B, :]

        f_t = act[:, 0 * H:1 * H]
        i_t = act[:, 1 * H:2 * H]
        o_t = act[:, 2 * H:3 * H]
        c_hat = act[:, 3 * H:4 * H]

        c = f_t * c + i_t * c_hat
        h = o_t * jnp.tanh(c)
        hs.append(h)

    # Single stacked store (one output writeback).
    out_ref[...] = jnp.stack(hs + [c], axis=0).astype(out_ref.dtype)


def epsilon_greedy_lstm(x_seq, params, coins, rand_gates, *, epsilon=EPSILON):
    """x_seq: (S, B, I) f32. Returns (outputs (S, B, H), (h_T, c_T))."""
    S, B, I = x_seq.shape
    H = params["wf"].shape[1]
    G = 4 * H

    # Fuse gate weights/biases: columns packed as [f | i | o | c].
    w_fused = jnp.concatenate(
        [params["wf"], params["wi"], params["wo"], params["wc"]], axis=1
    )                                                   # (H+I, 4H)
    b_fused = jnp.concatenate(
        [params["bf"], params["bi"], params["bo"], params["bc"]], axis=1
    )                                                   # (1, 4H)
    w_h = w_fused[:H, :]                                # (H, 4H)
    w_x = w_fused[H:, :]                                # (I, 4H)

    # Lane-dense 2-D input slab for the hoisted projection.
    x_flat = x_seq.reshape(S * B, I)

    # Precompute the epsilon coin test + replacement noise as blend terms.
    sel = (coins < epsilon).astype(jnp.float32)                              # (S, 3)
    sel_lanes = jnp.concatenate(
        [jnp.repeat(sel, H, axis=1), jnp.zeros((S, H), jnp.float32)], axis=1)  # (S, 4H)
    keep_flat = jnp.broadcast_to(
        (1.0 - sel_lanes)[:, None, :], (S, B, G)).reshape(S * B, G)
    rand_packed = jnp.transpose(rand_gates, (0, 2, 1, 3)).reshape(S, B, 3 * H)
    rand_packed = jnp.concatenate(
        [rand_packed, jnp.zeros((S, B, H), jnp.float32)], axis=-1)           # (S, B, 4H)
    rand_term = (rand_packed * sel_lanes[:, None, :]).reshape(S * B, G)

    kernel = functools.partial(_eps_lstm_kernel, seq_len=S, batch=B, hidden=H)
    vmem = pl.BlockSpec(memory_space=pltpu.MemorySpace.VMEM)

    out = pl.pallas_call(
        kernel,
        out_shape=jax.ShapeDtypeStruct((S + 1, B, H), jnp.float32),
        in_specs=[vmem, vmem, vmem, vmem, vmem, vmem],
        out_specs=vmem,
    )(x_flat, w_h, w_x, b_fused, keep_flat, rand_term)

    outputs = out[:S]          # (S, B, H)
    h_T = out[S - 1]           # == outputs[-1]
    c_T = out[S]
    return outputs, (h_T, c_T)


def reference_forward(x_seq, params, coins, rand_gates, *, epsilon=EPSILON):
    """Pure-JAX reimplementation of the PyTorch forward (same RNG draws)."""
    S, B, I = x_seq.shape
    H = params["wf"].shape[1]
    h = jnp.zeros((B, H), jnp.float32)
    c = jnp.zeros((B, H), jnp.float32)
    outs = []
    for t in range(S):
        x = x_seq[t]                                   # x_t.view(-1, 5) == identity
        combined = jnp.concatenate([h, x], axis=1)     # h_t.view(-1, 2) == identity
        lin = lambda w, b: combined @ w + b
        f = jax.nn.sigmoid(lin(params["wf"], params["bf"]))
        i = jax.nn.sigmoid(lin(params["wi"], params["bi"]))
        o = jax.nn.sigmoid(lin(params["wo"], params["bo"]))
        c_hat = jnp.tanh(lin(params["wc"], params["bc"]))
        f = jnp.where(coins[t, 0] < epsilon, rand_gates[t, 0], f)
        i = jnp.where(coins[t, 1] < epsilon, rand_gates[t, 1], i)
        o = jnp.where(coins[t, 2] < epsilon, rand_gates[t, 2], o)
        c = f * c + i * c_hat
        h = o * jnp.tanh(c)
        outs.append(h)
    return jnp.stack(outs, axis=0), (h, c)


def init_params(key, input_size, hidden_size):
    """Deterministic nn.Linear-style init; weights stored transposed (in, out)."""
    fan_in = input_size + hidden_size
    bound = 1.0 / jnp.sqrt(jnp.float32(fan_in))
    params = {}
    for name in ("f", "i", "c", "o"):
        key, kw, kb = jax.random.split(key, 3)
        params["w" + name] = jax.random.uniform(
            kw, (fan_in, hidden_size), jnp.float32, -bound, bound)
        params["b" + name] = jax.random.uniform(
            kb, (1, hidden_size), jnp.float32, -bound, bound)
    return params


if __name__ == "__main__":
    # Shapes implied by the forward: input_size=5, hidden_size=2, batch == seq.
    S = 8      # sequence_length
    B = 8      # batch_size (must equal S for the reference forward to run)
    I = 5      # input_size  (hard-coded by x_t.view(-1, 5))
    H = 2      # hidden_size (hard-coded by h_t.view(-1, 2))

    key = jax.random.PRNGKey(0)
    k_x, k_p, k_coin, k_rand = jax.random.split(key, 4)

    x_seq = jax.random.normal(k_x, (S, B, I), dtype=jnp.float32)
    params = init_params(k_p, I, H)
    # deterministic stand-in for python `random.random()` / `torch.rand_like`
    coins = jax.random.uniform(k_coin, (S, 3), dtype=jnp.float32)
    rand_gates = jax.random.uniform(k_rand, (S, 3, B, H), dtype=jnp.float32)

    outs, (h_T, c_T) = epsilon_greedy_lstm(x_seq, params, coins, rand_gates)
    jax.block_until_ready((outs, h_T, c_T))

    ref_outs, (ref_h, ref_c) = reference_forward(x_seq, params, coins, rand_gates)
    assert jnp.allclose(outs, ref_outs, atol=1e-5), "outputs mismatch"
    assert jnp.allclose(h_T, ref_h, atol=1e-5), "h_T mismatch"
    assert jnp.allclose(c_T, ref_c, atol=1e-5), "c_T mismatch"

    print("KERNEL_OK")
</pallas_src>

<mosaic_0001>
module attributes {stable_mosaic.version = 11 : i64} {
  func.func @_eps_lstm_kernel(%arg0: memref<64x5xf32, #tpu.memory_space<vmem>>, %arg1: memref<2x8xf32, #tpu.memory_space<vmem>>, %arg2: memref<5x8xf32, #tpu.memory_space<vmem>>, %arg3: memref<1x8xf32, #tpu.memory_space<vmem>>, %arg4: memref<64x8xf32, #tpu.memory_space<vmem>>, %arg5: memref<64x8xf32, #tpu.memory_space<vmem>>, %arg6: memref<9x8x2xf32, #tpu.memory_space<vmem>>) attributes {dimension_semantics = [], scalar_prefetch = 0 : i64, scratch_operands = 0 : i64, tpu.core_type = #tpu.core_type<tc>} {
    %c0 = arith.constant 0 : index
    %c0_0 = arith.constant 0 : index
    %0 = vector.load %arg1[%c0, %c0_0] : memref<2x8xf32, #tpu.memory_space<vmem>>, vector<2x8xf32>
    %c0_1 = arith.constant 0 : index
    %c0_2 = arith.constant 0 : index
    %1 = vector.load %arg0[%c0_1, %c0_2] : memref<64x5xf32, #tpu.memory_space<vmem>>, vector<64x5xf32>
    %c0_3 = arith.constant 0 : index
    %c0_4 = arith.constant 0 : index
    %2 = vector.load %arg2[%c0_3, %c0_4] : memref<5x8xf32, #tpu.memory_space<vmem>>, vector<5x8xf32>
    %cst = arith.constant dense<0.000000e+00> : vector<64x8xf32>
    %3 = tpu.matmul %1, %2, %cst {dimension_numbers = #tpu.dot_dimension_numbers<[1], [0], [0], [1], [0, 0, 1, 1], [], []>} : vector<64x5xf32>, vector<5x8xf32>, vector<64x8xf32> -> vector<64x8xf32>
    %c0_5 = arith.constant 0 : index
    %c0_6 = arith.constant 0 : index
    %4 = vector.load %arg3[%c0_5, %c0_6] : memref<1x8xf32, #tpu.memory_space<vmem>>, vector<1x8xf32>
    %5 = vector.broadcast %4 : vector<1x8xf32> to vector<64x8xf32>
    %6 = arith.addf %3, %5 : vector<64x8xf32>
    %c0_7 = arith.constant 0 : index
    %c0_8 = arith.constant 0 : index
    %7 = vector.load %arg4[%c0_7, %c0_8] : memref<64x8xf32, #tpu.memory_space<vmem>>, vector<64x8xf32>
    %c0_9 = arith.constant 0 : index
    %c0_10 = arith.constant 0 : index
    %8 = vector.load %arg5[%c0_9, %c0_10] : memref<64x8xf32, #tpu.memory_space<vmem>>, vector<64x8xf32>
    %9 = tpu.iota {dimensions = array<i32: 1>} : vector<8x8xi32>
    %c6_i32 = arith.constant 6 : i32
    %10 = vector.broadcast %c6_i32 : i32 to vector<8x8xi32>
    %11 = arith.cmpi slt, %9, %10 : vector<8x8xi32>
    %cst_11 = arith.constant 0.000000e+00 : f32
    %12 = vector.broadcast %cst_11 : f32 to vector<8x2xf32>
    %cst_12 = arith.constant 0.000000e+00 : f32
    %13 = vector.broadcast %cst_12 : f32 to vector<8x2xf32>
    %14 = vector.extract_strided_slice %6 {offsets = [0, 0], sizes = [8, 8], strides = [1, 1]} : vector<64x8xf32> to vector<8x8xf32>
    %15 = vector.extract_strided_slice %12 {offsets = [0, 0], sizes = [8, 1], strides = [1, 1]} : vector<8x2xf32> to vector<8x1xf32>
    %16 = vector.extract_strided_slice %0 {offsets = [0, 0], sizes = [1, 8], strides = [1, 1]} : vector<2x8xf32> to vector<1x8xf32>
    %17 = vector.broadcast %15 : vector<8x1xf32> to vector<8x8xf32>
    %18 = vector.broadcast %16 : vector<1x8xf32> to vector<8x8xf32>
    %19 = arith.mulf %17, %18 : vector<8x8xf32>
    %20 = arith.addf %14, %19 : vector<8x8xf32>
    %21 = vector.extract_strided_slice %12 {offsets = [0, 1], sizes = [8, 1], strides = [1, 1]} : vector<8x2xf32> to vector<8x1xf32>
    %22 = vector.extract_strided_slice %0 {offsets = [1, 0], sizes = [1, 8], strides = [1, 1]} : vector<2x8xf32> to vector<1x8xf32>
    %23 = vector.broadcast %21 : vector<8x1xf32> to vector<8x8xf32>
    %24 = vector.broadcast %22 : vector<1x8xf32> to vector<8x8xf32>
    %25 = arith.mulf %23, %24 : vector<8x8xf32>
    %26 = arith.addf %20, %25 : vector<8x8xf32>
    %27 = arith.negf %26 : vector<8x8xf32>
    %28 = math.exp %27 : vector<8x8xf32>
    %cst_13 = arith.constant 1.000000e+00 : f32
    %29 = vector.broadcast %cst_13 : f32 to vector<8x8xf32>
    %30 = arith.addf %29, %28 : vector<8x8xf32>
    %31 = arith.divf %29, %30 : vector<8x8xf32>
    %32 = math.tanh %26 : vector<8x8xf32>
    %33 = arith.select %11, %31, %32 : vector<8x8xi1>, vector<8x8xf32>
    %34 = vector.extract_strided_slice %7 {offsets = [0, 0], sizes = [8, 8], strides = [1, 1]} : vector<64x8xf32> to vector<8x8xf32>
    %35 = arith.mulf %33, %34 : vector<8x8xf32>
    %36 = vector.extract_strided_slice %8 {offsets = [0, 0], sizes = [8, 8], strides = [1, 1]} : vector<64x8xf32> to vector<8x8xf32>
    %37 = arith.addf %35, %36 : vector<8x8xf32>
    %38 = vector.extract_strided_slice %37 {offsets = [0, 0], sizes = [8, 2], strides = [1, 1]} : vector<8x8xf32> to vector<8x2xf32>
    %39 = vector.extract_strided_slice %37 {offsets = [0, 2], sizes = [8, 2], strides = [1, 1]} : vector<8x8xf32> to vector<8x2xf32>
    %40 = vector.extract_strided_slice %37 {offsets = [0, 4], sizes = [8, 2], strides = [1, 1]} : vector<8x8xf32> to vector<8x2xf32>
    %41 = vector.extract_strided_slice %37 {offsets = [0, 6], sizes = [8, 2], strides = [1, 1]} : vector<8x8xf32> to vector<8x2xf32>
    %42 = arith.mulf %38, %13 : vector<8x2xf32>
    %43 = arith.mulf %39, %41 : vector<8x2xf32>
    %44 = arith.addf %42, %43 : vector<8x2xf32>
    %45 = math.tanh %44 : vector<8x2xf32>
    %46 = arith.mulf %40, %45 : vector<8x2xf32>
    %47 = vector.extract_strided_slice %6 {offsets = [8, 0], sizes = [8, 8], strides = [1, 1]} : vector<64x8xf32> to vector<8x8xf32>
    %48 = vector.extract_strided_slice %46 {offsets = [0, 0], sizes = [8, 1], strides = [1, 1]} : vector<8x2xf32> to vector<8x1xf32>
    %49 = vector.extract_strided_slice %0 {offsets = [0, 0], sizes = [1, 8], strides = [1, 1]} : vector<2x8xf32> to vector<1x8xf32>
    %50 = vector.broadcast %48 : vector<8x1xf32> to vector<8x8xf32>
    %51 = vector.broadcast %49 : vector<1x8xf32> to vector<8x8xf32>
    %52 = arith.mulf %50, %51 : vector<8x8xf32>
    %53 = arith.addf %47, %52 : vector<8x8xf32>
    %54 = vector.extract_strided_slice %46 {offsets = [0, 1], sizes = [8, 1], strides = [1, 1]} : vector<8x2xf32> to vector<8x1xf32>
    %55 = vector.extract_strided_slice %0 {offsets = [1, 0], sizes = [1, 8], strides = [1, 1]} : vector<2x8xf32> to vector<1x8xf32>
    %56 = vector.broadcast %54 : vector<8x1xf32> to vector<8x8xf32>
    %57 = vector.broadcast %55 : vector<1x8xf32> to vector<8x8xf32>
    %58 = arith.mulf %56, %57 : vector<8x8xf32>
    %59 = arith.addf %53, %58 : vector<8x8xf32>
    %60 = arith.negf %59 : vector<8x8xf32>
    %61 = math.exp %60 : vector<8x8xf32>
    %cst_14 = arith.constant 1.000000e+00 : f32
    %62 = vector.broadcast %cst_14 : f32 to vector<8x8xf32>
    %63 = arith.addf %62, %61 : vector<8x8xf32>
    %64 = arith.divf %62, %63 : vector<8x8xf32>
    %65 = math.tanh %59 : vector<8x8xf32>
    %66 = arith.select %11, %64, %65 : vector<8x8xi1>, vector<8x8xf32>
    %67 = vector.extract_strided_slice %7 {offsets = [8, 0], sizes = [8, 8], strides = [1, 1]} : vector<64x8xf32> to vector<8x8xf32>
    %68 = arith.mulf %66, %67 : vector<8x8xf32>
    %69 = vector.extract_strided_slice %8 {offsets = [8, 0], sizes = [8, 8], strides = [1, 1]} : vector<64x8xf32> to vector<8x8xf32>
    %70 = arith.addf %68, %69 : vector<8x8xf32>
    %71 = vector.extract_strided_slice %70 {offsets = [0, 0], sizes = [8, 2], strides = [1, 1]} : vector<8x8xf32> to vector<8x2xf32>
    %72 = vector.extract_strided_slice %70 {offsets = [0, 2], sizes = [8, 2], strides = [1, 1]} : vector<8x8xf32> to vector<8x2xf32>
    %73 = vector.extract_strided_slice %70 {offsets = [0, 4], sizes = [8, 2], strides = [1, 1]} : vector<8x8xf32> to vector<8x2xf32>
    %74 = vector.extract_strided_slice %70 {offsets = [0, 6], sizes = [8, 2], strides = [1, 1]} : vector<8x8xf32> to vector<8x2xf32>
    %75 = arith.mulf %71, %44 : vector<8x2xf32>
    %76 = arith.mulf %72, %74 : vector<8x2xf32>
    %77 = arith.addf %75, %76 : vector<8x2xf32>
    %78 = math.tanh %77 : vector<8x2xf32>
    %79 = arith.mulf %73, %78 : vector<8x2xf32>
    %80 = vector.extract_strided_slice %6 {offsets = [16, 0], sizes = [8, 8], strides = [1, 1]} : vector<64x8xf32> to vector<8x8xf32>
    %81 = vector.extract_strided_slice %79 {offsets = [0, 0], sizes = [8, 1], strides = [1, 1]} : vector<8x2xf32> to vector<8x1xf32>
    %82 = vector.extract_strided_slice %0 {offsets = [0, 0], sizes = [1, 8], strides = [1, 1]} : vector<2x8xf32> to vector<1x8xf32>
    %83 = vector.broadcast %81 : vector<8x1xf32> to vector<8x8xf32>
    %84 = vector.broadcast %82 : vector<1x8xf32> to vector<8x8xf32>
    %85 = arith.mulf %83, %84 : vector<8x8xf32>
    %86 = arith.addf %80, %85 : vector<8x8xf32>
    %87 = vector.extract_strided_slice %79 {offsets = [0, 1], sizes = [8, 1], strides = [1, 1]} : vector<8x2xf32> to vector<8x1xf32>
    %88 = vector.extract_strided_slice %0 {offsets = [1, 0], sizes = [1, 8], strides = [1, 1]} : vector<2x8xf32> to vector<1x8xf32>
    %89 = vector.broadcast %87 : vector<8x1xf32> to vector<8x8xf32>
    %90 = vector.broadcast %88 : vector<1x8xf32> to vector<8x8xf32>
    %91 = arith.mulf %89, %90 : vector<8x8xf32>
    %92 = arith.addf %86, %91 : vector<8x8xf32>
    %93 = arith.negf %92 : vector<8x8xf32>
    %94 = math.exp %93 : vector<8x8xf32>
    %cst_15 = arith.constant 1.000000e+00 : f32
    %95 = vector.broadcast %cst_15 : f32 to vector<8x8xf32>
    %96 = arith.addf %95, %94 : vector<8x8xf32>
    %97 = arith.divf %95, %96 : vector<8x8xf32>
    %98 = math.tanh %92 : vector<8x8xf32>
    %99 = arith.select %11, %97, %98 : vector<8x8xi1>, vector<8x8xf32>
    %100 = vector.extract_strided_slice %7 {offsets = [16, 0], sizes = [8, 8], strides = [1, 1]} : vector<64x8xf32> to vector<8x8xf32>
    %101 = arith.mulf %99, %100 : vector<8x8xf32>
    %102 = vector.extract_strided_slice %8 {offsets = [16, 0], sizes = [8, 8], strides = [1, 1]} : vector<64x8xf32> to vector<8x8xf32>
    %103 = arith.addf %101, %102 : vector<8x8xf32>
    %104 = vector.extract_strided_slice %103 {offsets = [0, 0], sizes = [8, 2], strides = [1, 1]} : vector<8x8xf32> to vector<8x2xf32>
    %105 = vector.extract_strided_slice %103 {offsets = [0, 2], sizes = [8, 2], strides = [1, 1]} : vector<8x8xf32> to vector<8x2xf32>
    %106 = vector.extract_strided_slice %103 {offsets = [0, 4], sizes = [8, 2], strides = [1, 1]} : vector<8x8xf32> to vector<8x2xf32>
    %107 = vector.extract_strided_slice %103 {offsets = [0, 6], sizes = [8, 2], strides = [1, 1]} : vector<8x8xf32> to vector<8x2xf32>
    %108 = arith.mulf %104, %77 : vector<8x2xf32>
    %109 = arith.mulf %105, %107 : vector<8x2xf32>
    %110 = arith.addf %108, %109 : vector<8x2xf32>
    %111 = math.tanh %110 : vector<8x2xf32>
    %112 = arith.mulf %106, %111 : vector<8x2xf32>
    %113 = vector.extract_strided_slice %6 {offsets = [24, 0], sizes = [8, 8], strides = [1, 1]} : vector<64x8xf32> to vector<8x8xf32>
    %114 = vector.extract_strided_slice %112 {offsets = [0, 0], sizes = [8, 1], strides = [1, 1]} : vector<8x2xf32> to vector<8x1xf32>
    %115 = vector.extract_strided_slice %0 {offsets = [0, 0], sizes = [1, 8], strides = [1, 1]} : vector<2x8xf32> to vector<1x8xf32>
    %116 = vector.broadcast %114 : vector<8x1xf32> to vector<8x8xf32>
    %117 = vector.broadcast %115 : vector<1x8xf32> to vector<8x8xf32>
    %118 = arith.mulf %116, %117 : vector<8x8xf32>
    %119 = arith.addf %113, %118 : vector<8x8xf32>
    %120 = vector.extract_strided_slice %112 {offsets = [0, 1], sizes = [8, 1], strides = [1, 1]} : vector<8x2xf32> to vector<8x1xf32>
    %121 = vector.extract_strided_slice %0 {offsets = [1, 0], sizes = [1, 8], strides = [1, 1]} : vector<2x8xf32> to vector<1x8xf32>
    %122 = vector.broadcast %120 : vector<8x1xf32> to vector<8x8xf32>
    %123 = vector.broadcast %121 : vector<1x8xf32> to vector<8x8xf32>
    %124 = arith.mulf %122, %123 : vector<8x8xf32>
    %125 = arith.addf %119, %124 : vector<8x8xf32>
    %126 = arith.negf %125 : vector<8x8xf32>
    %127 = math.exp %126 : vector<8x8xf32>
    %cst_16 = arith.constant 1.000000e+00 : f32
    %128 = vector.broadcast %cst_16 : f32 to vector<8x8xf32>
    %129 = arith.addf %128, %127 : vector<8x8xf32>
    %130 = arith.divf %128, %129 : vector<8x8xf32>
    %131 = math.tanh %125 : vector<8x8xf32>
    %132 = arith.select %11, %130, %131 : vector<8x8xi1>, vector<8x8xf32>
    %133 = vector.extract_strided_slice %7 {offsets = [24, 0], sizes = [8, 8], strides = [1, 1]} : vector<64x8xf32> to vector<8x8xf32>
    %134 = arith.mulf %132, %133 : vector<8x8xf32>
    %135 = vector.extract_strided_slice %8 {offsets = [24, 0], sizes = [8, 8], strides = [1, 1]} : vector<64x8xf32> to vector<8x8xf32>
    %136 = arith.addf %134, %135 : vector<8x8xf32>
    %137 = vector.extract_strided_slice %136 {offsets = [0, 0], sizes = [8, 2], strides = [1, 1]} : vector<8x8xf32> to vector<8x2xf32>
    %138 = vector.extract_strided_slice %136 {offsets = [0, 2], sizes = [8, 2], strides = [1, 1]} : vector<8x8xf32> to vector<8x2xf32>
    %139 = vector.extract_strided_slice %136 {offsets = [0, 4], sizes = [8, 2], strides = [1, 1]} : vector<8x8xf32> to vector<8x2xf32>
    %140 = vector.extract_strided_slice %136 {offsets = [0, 6], sizes = [8, 2], strides = [1, 1]} : vector<8x8xf32> to vector<8x2xf32>
    %141 = arith.mulf %137, %110 : vector<8x2xf32>
    %142 = arith.mulf %138, %140 : vector<8x2xf32>
    %143 = arith.addf %141, %142 : vector<8x2xf32>
    %144 = math.tanh %143 : vector<8x2xf32>
    %145 = arith.mulf %139, %144 : vector<8x2xf32>
    %146 = vector.extract_strided_slice %6 {offsets = [32, 0], sizes = [8, 8], strides = [1, 1]} : vector<64x8xf32> to vector<8x8xf32>
    %147 = vector.extract_strided_slice %145 {offsets = [0, 0], sizes = [8, 1], strides = [1, 1]} : vector<8x2xf32> to vector<8x1xf32>
    %148 = vector.extract_strided_slice %0 {offsets = [0, 0], sizes = [1, 8], strides = [1, 1]} : vector<2x8xf32> to vector<1x8xf32>
    %149 = vector.broadcast %147 : vector<8x1xf32> to vector<8x8xf32>
    %150 = vector.broadcast %148 : vector<1x8xf32> to vector<8x8xf32>
    %151 = arith.mulf %149, %150 : vector<8x8xf32>
    %152 = arith.addf %146, %151 : vector<8x8xf32>
    %153 = vector.extract_strided_slice %145 {offsets = [0, 1], sizes = [8, 1], strides = [1, 1]} : vector<8x2xf32> to vector<8x1xf32>
    %154 = vector.extract_strided_slice %0 {offsets = [1, 0], sizes = [1, 8], strides = [1, 1]} : vector<2x8xf32> to vector<1x8xf32>
    %155 = vector.broadcast %153 : vector<8x1xf32> to vector<8x8xf32>
    %156 = vector.broadcast %154 : vector<1x8xf32> to vector<8x8xf32>
    %157 = arith.mulf %155, %156 : vector<8x8xf32>
    %158 = arith.addf %152, %157 : vector<8x8xf32>
    %159 = arith.negf %158 : vector<8x8xf32>
    %160 = math.exp %159 : vector<8x8xf32>
    %cst_17 = arith.constant 1.000000e+00 : f32
    %161 = vector.broadcast %cst_17 : f32 to vector<8x8xf32>
    %162 = arith.addf %161, %160 : vector<8x8xf32>
    %163 = arith.divf %161, %162 : vector<8x8xf32>
    %164 = math.tanh %158 : vector<8x8xf32>
    %165 = arith.select %11, %163, %164 : vector<8x8xi1>, vector<8x8xf32>
    %166 = vector.extract_strided_slice %7 {offsets = [32, 0], sizes = [8, 8], strides = [1, 1]} : vector<64x8xf32> to vector<8x8xf32>
    %167 = arith.mulf %165, %166 : vector<8x8xf32>
    %168 = vector.extract_strided_slice %8 {offsets = [32, 0], sizes = [8, 8], strides = [1, 1]} : vector<64x8xf32> to vector<8x8xf32>
    %169 = arith.addf %167, %168 : vector<8x8xf32>
    %170 = vector.extract_strided_slice %169 {offsets = [0, 0], sizes = [8, 2], strides = [1, 1]} : vector<8x8xf32> to vector<8x2xf32>
    %171 = vector.extract_strided_slice %169 {offsets = [0, 2], sizes = [8, 2], strides = [1, 1]} : vector<8x8xf32> to vector<8x2xf32>
    %172 = vector.extract_strided_slice %169 {offsets = [0, 4], sizes = [8, 2], strides = [1, 1]} : vector<8x8xf32> to vector<8x2xf32>
    %173 = vector.extract_strided_slice %169 {offsets = [0, 6], sizes = [8, 2], strides = [1, 1]} : vector<8x8xf32> to vector<8x2xf32>
    %174 = arith.mulf %170, %143 : vector<8x2xf32>
    %175 = arith.mulf %171, %173 : vector<8x2xf32>
    %176 = arith.addf %174, %175 : vector<8x2xf32>
    %177 = math.tanh %176 : vector<8x2xf32>
    %178 = arith.mulf %172, %177 : vector<8x2xf32>
    %179 = vector.extract_strided_slice %6 {offsets = [40, 0], sizes = [8, 8], strides = [1, 1]} : vector<64x8xf32> to vector<8x8xf32>
    %180 = vector.extract_strided_slice %178 {offsets = [0, 0], sizes = [8, 1], strides = [1, 1]} : vector<8x2xf32> to vector<8x1xf32>
    %181 = vector.extract_strided_slice %0 {offsets = [0, 0], sizes = [1, 8], strides = [1, 1]} : vector<2x8xf32> to vector<1x8xf32>
    %182 = vector.broadcast %180 : vector<8x1xf32> to vector<8x8xf32>
    %183 = vector.broadcast %181 : vector<1x8xf32> to vector<8x8xf32>
    %184 = arith.mulf %182, %183 : vector<8x8xf32>
    %185 = arith.addf %179, %184 : vector<8x8xf32>
    %186 = vector.extract_strided_slice %178 {offsets = [0, 1], sizes = [8, 1], strides = [1, 1]} : vector<8x2xf32> to vector<8x1xf32>
    %187 = vector.extract_strided_slice %0 {offsets = [1, 0], sizes = [1, 8], strides = [1, 1]} : vector<2x8xf32> to vector<1x8xf32>
    %188 = vector.broadcast %186 : vector<8x1xf32> to vector<8x8xf32>
    %189 = vector.broadcast %187 : vector<1x8xf32> to vector<8x8xf32>
    %190 = arith.mulf %188, %189 : vector<8x8xf32>
    %191 = arith.addf %185, %190 : vector<8x8xf32>
    %192 = arith.negf %191 : vector<8x8xf32>
    %193 = math.exp %192 : vector<8x8xf32>
    %cst_18 = arith.constant 1.000000e+00 : f32
    %194 = vector.broadcast %cst_18 : f32 to vector<8x8xf32>
    %195 = arith.addf %194, %193 : vector<8x8xf32>
    %196 = arith.divf %194, %195 : vector<8x8xf32>
    %197 = math.tanh %191 : vector<8x8xf32>
    %198 = arith.select %11, %196, %197 : vector<8x8xi1>, vector<8x8xf32>
    %199 = vector.extract_strided_slice %7 {offsets = [40, 0], sizes = [8, 8], strides = [1, 1]} : vector<64x8xf32> to vector<8x8xf32>
    %200 = arith.mulf %198, %199 : vector<8x8xf32>
    %201 = vector.extract_strided_slice %8 {offsets = [40, 0], sizes = [8, 8], strides = [1, 1]} : vector<64x8xf32> to vector<8x8xf32>
    %202 = arith.addf %200, %201 : vector<8x8xf32>
    %203 = vector.extract_strided_slice %202 {offsets = [0, 0], sizes = [8, 2], strides = [1, 1]} : vector<8x8xf32> to vector<8x2xf32>
    %204 = vector.extract_strided_slice %202 {offsets = [0, 2], sizes = [8, 2], strides = [1, 1]} : vector<8x8xf32> to vector<8x2xf32>
    %205 = vector.extract_strided_slice %202 {offsets = [0, 4], sizes = [8, 2], strides = [1, 1]} : vector<8x8xf32> to vector<8x2xf32>
    %206 = vector.extract_strided_slice %202 {offsets = [0, 6], sizes = [8, 2], strides = [1, 1]} : vector<8x8xf32> to vector<8x2xf32>
    %207 = arith.mulf %203, %176 : vector<8x2xf32>
    %208 = arith.mulf %204, %206 : vector<8x2xf32>
    %209 = arith.addf %207, %208 : vector<8x2xf32>
    %210 = math.tanh %209 : vector<8x2xf32>
    %211 = arith.mulf %205, %210 : vector<8x2xf32>
    %212 = vector.extract_strided_slice %6 {offsets = [48, 0], sizes = [8, 8], strides = [1, 1]} : vector<64x8xf32> to vector<8x8xf32>
    %213 = vector.extract_strided_slice %211 {offsets = [0, 0], sizes = [8, 1], strides = [1, 1]} : vector<8x2xf32> to vector<8x1xf32>
    %214 = vector.extract_strided_slice %0 {offsets = [0, 0], sizes = [1, 8], strides = [1, 1]} : vector<2x8xf32> to vector<1x8xf32>
    %215 = vector.broadcast %213 : vector<8x1xf32> to vector<8x8xf32>
    %216 = vector.broadcast %214 : vector<1x8xf32> to vector<8x8xf32>
    %217 = arith.mulf %215, %216 : vector<8x8xf32>
    %218 = arith.addf %212, %217 : vector<8x8xf32>
    %219 = vector.extract_strided_slice %211 {offsets = [0, 1], sizes = [8, 1], strides = [1, 1]} : vector<8x2xf32> to vector<8x1xf32>
    %220 = vector.extract_strided_slice %0 {offsets = [1, 0], sizes = [1, 8], strides = [1, 1]} : vector<2x8xf32> to vector<1x8xf32>
    %221 = vector.broadcast %219 : vector<8x1xf32> to vector<8x8xf32>
    %222 = vector.broadcast %220 : vector<1x8xf32> to vector<8x8xf32>
    %223 = arith.mulf %221, %222 : vector<8x8xf32>
    %224 = arith.addf %218, %223 : vector<8x8xf32>
    %225 = arith.negf %224 : vector<8x8xf32>
    %226 = math.exp %225 : vector<8x8xf32>
    %cst_19 = arith.constant 1.000000e+00 : f32
    %227 = vector.broadcast %cst_19 : f32 to vector<8x8xf32>
    %228 = arith.addf %227, %226 : vector<8x8xf32>
    %229 = arith.divf %227, %228 : vector<8x8xf32>
    %230 = math.tanh %224 : vector<8x8xf32>
    %231 = arith.select %11, %229, %230 : vector<8x8xi1>, vector<8x8xf32>
    %232 = vector.extract_strided_slice %7 {offsets = [48, 0], sizes = [8, 8], strides = [1, 1]} : vector<64x8xf32> to vector<8x8xf32>
    %233 = arith.mulf %231, %232 : vector<8x8xf32>
    %234 = vector.extract_strided_slice %8 {offsets = [48, 0], sizes = [8, 8], strides = [1, 1]} : vector<64x8xf32> to vector<8x8xf32>
    %235 = arith.addf %233, %234 : vector<8x8xf32>
    %236 = vector.extract_strided_slice %235 {offsets = [0, 0], sizes = [8, 2], strides = [1, 1]} : vector<8x8xf32> to vector<8x2xf32>
    %237 = vector.extract_strided_slice %235 {offsets = [0, 2], sizes = [8, 2], strides = [1, 1]} : vector<8x8xf32> to vector<8x2xf32>
    %238 = vector.extract_strided_slice %235 {offsets = [0, 4], sizes = [8, 2], strides = [1, 1]} : vector<8x8xf32> to vector<8x2xf32>
    %239 = vector.extract_strided_slice %235 {offsets = [0, 6], sizes = [8, 2], strides = [1, 1]} : vector<8x8xf32> to vector<8x2xf32>
    %240 = arith.mulf %236, %209 : vector<8x2xf32>
    %241 = arith.mulf %237, %239 : vector<8x2xf32>
    %242 = arith.addf %240, %241 : vector<8x2xf32>
    %243 = math.tanh %242 : vector<8x2xf32>
    %244 = arith.mulf %238, %243 : vector<8x2xf32>
    %245 = vector.extract_strided_slice %6 {offsets = [56, 0], sizes = [8, 8], strides = [1, 1]} : vector<64x8xf32> to vector<8x8xf32>
    %246 = vector.extract_strided_slice %244 {offsets = [0, 0], sizes = [8, 1], strides = [1, 1]} : vector<8x2xf32> to vector<8x1xf32>
    %247 = vector.extract_strided_slice %0 {offsets = [0, 0], sizes = [1, 8], strides = [1, 1]} : vector<2x8xf32> to vector<1x8xf32>
    %248 = vector.broadcast %246 : vector<8x1xf32> to vector<8x8xf32>
    %249 = vector.broadcast %247 : vector<1x8xf32> to vector<8x8xf32>
    %250 = arith.mulf %248, %249 : vector<8x8xf32>
    %251 = arith.addf %245, %250 : vector<8x8xf32>
    %252 = vector.extract_strided_slice %244 {offsets = [0, 1], sizes = [8, 1], strides = [1, 1]} : vector<8x2xf32> to vector<8x1xf32>
    %253 = vector.extract_strided_slice %0 {offsets = [1, 0], sizes = [1, 8], strides = [1, 1]} : vector<2x8xf32> to vector<1x8xf32>
    %254 = vector.broadcast %252 : vector<8x1xf32> to vector<8x8xf32>
    %255 = vector.broadcast %253 : vector<1x8xf32> to vector<8x8xf32>
    %256 = arith.mulf %254, %255 : vector<8x8xf32>
    %257 = arith.addf %251, %256 : vector<8x8xf32>
    %258 = arith.negf %257 : vector<8x8xf32>
    %259 = math.exp %258 : vector<8x8xf32>
    %cst_20 = arith.constant 1.000000e+00 : f32
    %260 = vector.broadcast %cst_20 : f32 to vector<8x8xf32>
    %261 = arith.addf %260, %259 : vector<8x8xf32>
    %262 = arith.divf %260, %261 : vector<8x8xf32>
    %263 = math.tanh %257 : vector<8x8xf32>
    %264 = arith.select %11, %262, %263 : vector<8x8xi1>, vector<8x8xf32>
    %265 = vector.extract_strided_slice %7 {offsets = [56, 0], sizes = [8, 8], strides = [1, 1]} : vector<64x8xf32> to vector<8x8xf32>
    %266 = arith.mulf %264, %265 : vector<8x8xf32>
    %267 = vector.extract_strided_slice %8 {offsets = [56, 0], sizes = [8, 8], strides = [1, 1]} : vector<64x8xf32> to vector<8x8xf32>
    %268 = arith.addf %266, %267 : vector<8x8xf32>
    %269 = vector.extract_strided_slice %268 {offsets = [0, 0], sizes = [8, 2], strides = [1, 1]} : vector<8x8xf32> to vector<8x2xf32>
    %270 = vector.extract_strided_slice %268 {offsets = [0, 2], sizes = [8, 2], strides = [1, 1]} : vector<8x8xf32> to vector<8x2xf32>
    %271 = vector.extract_strided_slice %268 {offsets = [0, 4], sizes = [8, 2], strides = [1, 1]} : vector<8x8xf32> to vector<8x2xf32>
    %272 = vector.extract_strided_slice %268 {offsets = [0, 6], sizes = [8, 2], strides = [1, 1]} : vector<8x8xf32> to vector<8x2xf32>
    %273 = arith.mulf %269, %242 : vector<8x2xf32>
    %274 = arith.mulf %270, %272 : vector<8x2xf32>
    %275 = arith.addf %273, %274 : vector<8x2xf32>
    %276 = math.tanh %275 : vector<8x2xf32>
    %277 = arith.mulf %271, %276 : vector<8x2xf32>
    %278 = vector.shape_cast %46 : vector<8x2xf32> to vector<1x8x2xf32>
    %279 = vector.shape_cast %79 : vector<8x2xf32> to vector<1x8x2xf32>
    %280 = vector.shape_cast %112 : vector<8x2xf32> to vector<1x8x2xf32>
    %281 = vector.shape_cast %145 : vector<8x2xf32> to vector<1x8x2xf32>
    %282 = vector.shape_cast %178 : vector<8x2xf32> to vector<1x8x2xf32>
    %283 = vector.shape_cast %211 : vector<8x2xf32> to vector<1x8x2xf32>
    %284 = vector.shape_cast %244 : vector<8x2xf32> to vector<1x8x2xf32>
    %285 = vector.shape_cast %277 : vector<8x2xf32> to vector<1x8x2xf32>
    %286 = vector.shape_cast %275 : vector<8x2xf32> to vector<1x8x2xf32>
    %287 = tpu.concatenate %278, %279, %280, %281, %282, %283, %284, %285, %286 in 0 : vector<1x8x2xf32>, vector<1x8x2xf32>, vector<1x8x2xf32>, vector<1x8x2xf32>, vector<1x8x2xf32>, vector<1x8x2xf32>, vector<1x8x2xf32>, vector<1x8x2xf32>, vector<1x8x2xf32> -> vector<9x8x2xf32>
    %c0_21 = arith.constant 0 : index
    %c0_22 = arith.constant 0 : index
    %c0_23 = arith.constant 0 : index
    %288 = vector.load %arg6[%c0_21, %c0_22, %c0_23] : memref<9x8x2xf32, #tpu.memory_space<vmem>>, vector<9x8x2xf32>
    tpu.vector_store %arg6[%c0_21, %c0_22, %c0_23], %287 {strides = array<i32>} : memref<9x8x2xf32, #tpu.memory_space<vmem>>, vector<9x8x2xf32>,
    return
  }
}

</mosaic_0001>

<bundles_post_ra>
// kernel: tpu_custom_call.1
= control target key start
LH: loop header
LB: loop body
LE: loop exit
PB: predicated region body
PF: predicated region fallthrough
CT: control target
= control target key end

     0   :  { %vm65_vm0 = vcmask 1044480   ;;  %vm40_vm1 = vcmask 39936   ;;  %v190_v3 = vlaneseq  ;;  %s678_s8 = smov 124   ;;  %s679_s9 = smov 126   ;;  %v680_v34 = vmov 5   ;;  %s965_s2 = inlined_call_operand.vmem [shape: f32[5,8], index: 2, kind: input, shape index: {}]   ;;  %s966_s0 = inlined_call_operand.vmem [shape: f32[64,5], index: 0, kind: input, shape index: {}]   ;;  %s967_s1 = inlined_call_operand.vmem [shape: f32[2,8], index: 1, kind: input, shape index: {}]   ;;  %s968_s3 = inlined_call_operand.vmem [shape: f32[1,8], index: 3, kind: input, shape index: {}]   ;;  %s969_s4 = inlined_call_operand.vmem [shape: f32[64,8], index: 4, kind: input, shape index: {}]   ;;  %s970_s5 = inlined_call_operand.vmem [shape: f32[64,8], index: 5, kind: input, shape index: {}]   ;;  %s971_s6 = inlined_call_operand.vmem [shape: f32[9,8,2], index: 6, kind: output, shape index: {}]  }
   0x1   :  { %v32_v0 = vld [vmem:[%s965_s2] sm:$0x1f]  ;;  %v25_v2 = vld [vmem:[%s966_s0 + $0x8] sm:$0xff]  ;;  %606 = vset.pattern.permute.xlu0 %v680_v34  ;;  %v681_v35 = vmov 4   ;;  %s682_s10 = smov 4   ;;  %v26_v58 = vld [vmem:[%s966_s0 + $0x10] sm:$0xff] }
   0x2   :  { %v24_v1 = vld [vmem:[%s966_s0] sm:$0xff]  ;;  %584 = vmatprep.subr.msk.mxu0 %vm65_vm0, %v32_v0  ;;  %598 = vmatprep.subr.msk.mxu1 %vm65_vm0, %v32_v0  ;;  %v194_v4 = vshrl.u32 %v190_v3, 7  ;;  %v744_v21 = vand.u32 127, %v190_v3  ;;  %v175_v50 = vld [vmem:[%s969_s4 + $0x8] sm:$0xff]  ;;  %v27_v59 = vld [vmem:[%s966_s0 + $0x18] sm:$0xff]  ;;  %vm543_vm3 = vcmask 15360  }
   0x3   :  { %586 = vmatprep.mubr.msk.f32.mxu0 %vm40_vm1, %v24_v1  ;;  %585 = vmatpush3.msk.msra.mxu0 %vm65_vm0, %v32_v0  ;;  %v23_v6 = vld [vmem:[%s967_s1] sm:$0x3]  ;;  %v183_v52 = vld [vmem:[%s970_s5 + $0x8] sm:$0xff] }
   0x4   :  { %587 = vmatmul.mubr.msk.f32.vlgmr.msra.gmra.mrb[0].mxu0 %vm40_vm1, %v25_v2  ;;  %599 = vmatpush3.msk.msra.mxu1 %vm65_vm0, %v32_v0  ;;  %v195_v5 = vsub.s32 0, %v194_v4  ;;  %v201_v7 = vsub.s32 1, %v194_v4  ;;  %v739_v10 = vld [vmem:[%s968_s3] ss:$0 sm:$0xff]  ;;  %vm192_vm2 = vcmp.lt.s32.totalorder %v744_v21, 6 }
   0x5   :  { %v174_v23 = vld [vmem:[%s969_s4] sm:$0xff]  ;;  %605 = vset.pattern.permute.xlu1 %v681_v35  ;;  %589 = vmatprep.mubr.msk.f32.mxu0 %vm40_vm1, %v26_v58 }
   0x6   :  { %v732_v8 = vrot.slane %v23_v6, %v195_v5  ;;  %v734_v9 = vrot.slane %v23_v6, %v201_v7  ;;  %v182_v25 = vld [vmem:[%s970_s5] sm:$0xff] }
   0x8   :  { %v197_v12 = vmul.f32 0.0, %v732_v8  ;;  %v203_v15 = vmul.f32 0.0, %v734_v9  ;;  %590 = vmatmul.mubr.msk.f32.gmra.mrb[2].mxu0 %vm40_vm1, %v27_v59 }
  0xd7   :  { %v588_v11 = vpop.f32.mrb[0].mxu0 }
  0xd8   :  { %v135_v13 = vpop.f32.mrb[1].mxu0  ;;  %v141_v41 = vadd.f32 %v588_v11, %v739_v10 }
  0xd9   :  { %v136_v14 = vadd.f32 %v739_v10, %v135_v13 }
  0xdb   :  { %v198_v16 = vadd.f32 %v197_v12, %v136_v14  ;;  %v591_v0 = vpop.f32.mrb[2].mxu0 }
  0xdc   :  { %v145_v1 = vpop.f32.mrb[3].mxu0 }
  0xdd   :  { %v204_v17 = vadd.f32 %v203_v15, %v198_v16  ;;  %v146_v4 = vadd.f32 %v739_v10, %v145_v1 }
  0xdf   :  { %v567_v18 = vmul.f32 -1.442695, %v204_v17 }
  0xe1   :  { %614 = vpow2.f32 %v567_v18  ;;  %v176_v18 = vld [vmem:[%s969_s4 + $0x10] sm:$0xff] }
  0xe2   :  { %616 = vtanh.f32 %v204_v17 }
  0xeb   :  { %v615_v19 = vpop.eup %614 }
  0xec   :  { %v208_v20 = vadd.f32 1.0, %v615_v19  ;;  %v617_v22 = vpop.eup %616 }
  0xee   :  { %618 = vrcp.f32 %v208_v20  ;;  %v184_v20 = vld [vmem:[%s970_s5 + $0x10] sm:$0xff] }
  0xf8   :  { %v619_v24 = vpop.eup %618 }
  0xf9   :  { %v212_v26 = vsel %vm192_vm2, %v619_v24, %v617_v22 }
  0xfa   :  { %v213_v27 = vmul.f32 %v212_v26, %v174_v23 }
  0xfc   :  { %v214_v28 = vadd.f32 %v213_v27, %v182_v25 }
  0xfe   :  { %217 = vrot.lane.b32.xlu0 %v214_v28, %s678_s8  ;;  %v215_v31 = vmul.f32 0.0, %v214_v28 }
 0x170   :  { %v218_v29 = vpop.permute.xlu0 %217 }
 0x171   :  { %v220_v30 = vmul.f32 %v218_v29, %v214_v28 }
 0x173   :  { %222 = vrot.lane.b32.xlu0 %v220_v30, %s679_s9 }
 0x1e5   :  { %v223_v32 = vpop.permute.xlu0 %222 }
 0x1e6   :  { %v225_v33 = vadd.f32 %v223_v32, %v215_v31 }
 0x1e8   :  { %620 = vtanh.f32 %v225_v33 }
 0x1f2   :  { %v621_v36 = vpop.eup %620 }
 0x1f3   :  { %228 = vrot.lane.b32.xlu1 %v621_v36, %s682_s10 }
 0x265   :  { %v229_v37 = vpop.permute.xlu1 %228 }
 0x266   :  { %v760_v38 = vmul.f32 %v229_v37, %v214_v28  ;;  %v151_v37 = vadd.f32 %v591_v0, %v739_v10 }
 0x268   :  { %240 = vperm.xlu0 %606, %v760_v38   ;;  %234 = vperm.xlu1 %605, %v760_v38  }
 0x2e7   :  { %v241_v39 = vpop.permute.xlu0 %240  ;;  %v235_v40 = vpop.permute.xlu1 %234 }
 0x2e8   :  { %v237_v42 = vmul.f32 %v235_v40, %v732_v8  ;;  %v243_v43 = vmul.f32 %v241_v39, %v734_v9 }
 0x2ea   :  { %v238_v44 = vadd.f32 %v237_v42, %v141_v41 }
 0x2ec   :  { %v244_v45 = vadd.f32 %v243_v43, %v238_v44 }
 0x2ee   :  { %v568_v46 = vmul.f32 -1.442695, %v244_v45 }
 0x2f0   :  { %622 = vpow2.f32 %v568_v46 }
 0x2f1   :  { %624 = vtanh.f32 %v244_v45 }
 0x2fa   :  { %v623_v47 = vpop.eup %622 }
 0x2fb   :  { %v248_v48 = vadd.f32 1.0, %v623_v47  ;;  %v625_v49 = vpop.eup %624  ;;  %v177_v47 = vld [vmem:[%s969_s4 + $0x18] sm:$0xff] }
 0x2fd   :  { %626 = vrcp.f32 %v248_v48 }
 0x307   :  { %v627_v51 = vpop.eup %626 }
 0x308   :  { %v252_v53 = vsel %vm192_vm2, %v627_v51, %v625_v49  ;;  %v185_v49 = vld [vmem:[%s970_s5 + $0x18] sm:$0xff] }
 0x309   :  { %v253_v54 = vmul.f32 %v252_v53, %v175_v50 }
 0x30b   :  { %v254_v55 = vadd.f32 %v253_v54, %v183_v52 }
 0x30d   :  { %257 = vrot.lane.b32.xlu1 %v254_v55, %s678_s8  ;;  %v255_v60 = vmul.f32 %v254_v55, %v225_v33 }
 0x37f   :  { %v258_v56 = vpop.permute.xlu1 %257 }
 0x380   :  { %v260_v57 = vmul.f32 %v258_v56, %v254_v55  ;;  %v29_v56 = vld [vmem:[%s966_s0 + $0x28] sm:$0xff] }
 0x382   :  { %262 = vrot.lane.b32.xlu1 %v260_v57, %s679_s9 }
 0x3f4   :  { %v263_v61 = vpop.permute.xlu1 %262 }
 0x3f5   :  { %v265_v62 = vadd.f32 %v263_v61, %v255_v60 }
 0x3f7   :  { %628 = vtanh.f32 %v265_v62 }
 0x401   :  { %v629_v63 = vpop.eup %628 }
 0x402   :  { %268 = vrot.lane.b32.xlu0 %v629_v63, %s682_s10 }
 0x474   :  { %v269_v2 = vpop.permute.xlu0 %268 }
 0x475   :  { %v786_v3 = vmul.f32 %v269_v2, %v254_v55  ;;  %v28_v55 = vld [vmem:[%s966_s0 + $0x20] sm:$0xff] }
 0x476   :  { %592 = vmatprep.mubr.msk.f32.mxu1 %vm40_vm1, %v28_v55  ;;  %v31_v55 = vld [vmem:[%s966_s0 + $0x38] sm:$0xff] }
 0x477   :  { %280 = vperm.xlu0 %606, %v786_v3   ;;  %274 = vperm.xlu1 %605, %v786_v3  }
 0x478   :  { %593 = vmatmul.mubr.msk.f32.vlgmr.msra.gmra.mrb[0].mxu1 %vm40_vm1, %v29_v56 }
 0x47b   :  { %607 = vset.pattern.permute.xlu0 %v681_v35  ;;  %608 = vset.pattern.permute.xlu1 %v680_v34 }
 0x4f6   :  { %v281_v5 = vpop.permute.xlu0 %280  ;;  %v275_v6 = vpop.permute.xlu1 %274 }
 0x4f7   :  { %v277_v7 = vmul.f32 %v275_v6, %v732_v8  ;;  %v283_v11 = vmul.f32 %v281_v5, %v734_v9 }
 0x4f9   :  { %v278_v12 = vadd.f32 %v277_v7, %v146_v4 }
 0x4fb   :  { %v284_v13 = vadd.f32 %v283_v11, %v278_v12 }
 0x4fd   :  { %v569_v14 = vmul.f32 -1.442695, %v284_v13 }
 0x4ff   :  { %630 = vpow2.f32 %v569_v14 }
 0x500   :  { %632 = vtanh.f32 %v284_v13 }
 0x509   :  { %v631_v15 = vpop.eup %630 }
 0x50a   :  { %v288_v16 = vadd.f32 1.0, %v631_v15  ;;  %v633_v17 = vpop.eup %632 }
 0x50c   :  { %634 = vrcp.f32 %v288_v16  ;;  %v178_v16 = vld [vmem:[%s969_s4 + $0x20] sm:$0xff] }
 0x516   :  { %v635_v19 = vpop.eup %634 }
 0x517   :  { %v292_v22 = vsel %vm192_vm2, %v635_v19, %v633_v17 }
 0x518   :  { %v293_v23 = vmul.f32 %v292_v22, %v176_v18  ;;  %v186_v18 = vld [vmem:[%s970_s5 + $0x20] sm:$0xff] }
 0x51a   :  { %v294_v24 = vadd.f32 %v293_v23, %v184_v20 }
 0x51c   :  { %297 = vrot.lane.b32.xlu1 %v294_v24, %s678_s8  ;;  %v295_v27 = vmul.f32 %v294_v24, %v265_v62 }
 0x54b   :  { %v594_v61 = vpop.f32.mrb[0].mxu1 }
 0x54c   :  { %v155_v62 = vpop.f32.mrb[1].mxu1 }
 0x54d   :  { %v156_v1 = vadd.f32 %v739_v10, %v155_v62 }
 0x58e   :  { %v298_v25 = vpop.permute.xlu1 %297 }
 0x58f   :  { %v300_v26 = vmul.f32 %v298_v25, %v294_v24 }
 0x591   :  { %302 = vrot.lane.b32.xlu0 %v300_v26, %s679_s9 }
 0x603   :  { %v303_v28 = vpop.permute.xlu0 %302 }
 0x604   :  { %v305_v29 = vadd.f32 %v303_v28, %v295_v27 }
 0x606   :  { %636 = vtanh.f32 %v305_v29 }
 0x610   :  { %v637_v30 = vpop.eup %636 }
 0x611   :  { %308 = vrot.lane.b32.xlu1 %v637_v30, %s682_s10 }
 0x683   :  { %v309_v31 = vpop.permute.xlu1 %308 }
 0x684   :  { %v806_v32 = vmul.f32 %v309_v31, %v294_v24 }
 0x686   :  { %320 = vperm.xlu1 %608, %v806_v32   ;;  %314 = vperm.xlu0 %607, %v806_v32  }
 0x705   :  { %v321_v33 = vpop.permute.xlu1 %320  ;;  %v315_v36 = vpop.permute.xlu0 %314 }
 0x706   :  { %v317_v39 = vmul.f32 %v315_v36, %v732_v8  ;;  %v323_v40 = vmul.f32 %v321_v33, %v734_v9  ;;  %v161_v36 = vadd.f32 %v594_v61, %v739_v10 }
 0x708   :  { %v318_v41 = vadd.f32 %v317_v39, %v151_v37 }
 0x70a   :  { %v324_v42 = vadd.f32 %v323_v40, %v318_v41 }
 0x70c   :  { %v570_v43 = vmul.f32 -1.442695, %v324_v42 }
 0x70e   :  { %638 = vpow2.f32 %v570_v43 }
 0x70f   :  { %640 = vtanh.f32 %v324_v42 }
 0x718   :  { %v639_v44 = vpop.eup %638 }
 0x719   :  { %v328_v45 = vadd.f32 1.0, %v639_v44  ;;  %v641_v46 = vpop.eup %640 }
 0x71b   :  { %642 = vrcp.f32 %v328_v45 }
 0x725   :  { %v643_v48 = vpop.eup %642 }
 0x726   :  { %v332_v50 = vsel %vm192_vm2, %v643_v48, %v641_v46  ;;  %v179_v46 = vld [vmem:[%s969_s4 + $0x28] sm:$0xff] }
 0x727   :  { %v333_v51 = vmul.f32 %v332_v50, %v177_v47  ;;  %v187_v48 = vld [vmem:[%s970_s5 + $0x28] sm:$0xff] }
 0x729   :  { %v334_v52 = vadd.f32 %v333_v51, %v185_v49 }
 0x72b   :  { %337 = vrot.lane.b32.xlu1 %v334_v52, %s678_s8  ;;  %v335_v57 = vmul.f32 %v334_v52, %v305_v29 }
 0x79d   :  { %v338_v53 = vpop.permute.xlu1 %337 }
 0x79e   :  { %v340_v54 = vmul.f32 %v338_v53, %v334_v52 }
 0x7a0   :  { %342 = vrot.lane.b32.xlu0 %v340_v54, %s679_s9  ;;  %v30_v54 = vld [vmem:[%s966_s0 + $0x30] sm:$0xff] }
 0x7a1   :  { %595 = vmatprep.mubr.msk.f32.mxu1 %vm40_vm1, %v30_v54 }
 0x7a2   :  { %596 = vmatmul.mubr.msk.f32.gmra.mrb[2].mxu1 %vm40_vm1, %v31_v55 }
 0x812   :  { %v343_v58 = vpop.permute.xlu0 %342 }
 0x813   :  { %v345_v59 = vadd.f32 %v343_v58, %v335_v57 }
 0x815   :  { %644 = vtanh.f32 %v345_v59 }
 0x81f   :  { %v645_v60 = vpop.eup %644 }
 0x820   :  { %348 = vrot.lane.b32.xlu1 %v645_v60, %s682_s10 }
 0x875   :  { %v597_v60 = vpop.f32.mrb[2].mxu1 }
 0x876   :  { %v165_v61 = vpop.f32.mrb[3].mxu1 }
 0x892   :  { %v349_v63 = vpop.permute.xlu1 %348 }
 0x893   :  { %v832_v0 = vmul.f32 %v349_v63, %v334_v52 }
 0x895   :  { %360 = vperm.xlu1 %608, %v832_v0   ;;  %354 = vperm.xlu0 %607, %v832_v0  }
 0x899   :  { %609 = vset.pattern.permute.xlu1 %v681_v35  ;;  %610 = vset.pattern.permute.xlu0 %v680_v34 }
 0x914   :  { %v361_v2 = vpop.permute.xlu1 %360  ;;  %v355_v4 = vpop.permute.xlu0 %354 }
 0x915   :  { %v357_v5 = vmul.f32 %v355_v4, %v732_v8  ;;  %v363_v6 = vmul.f32 %v361_v2, %v734_v9 }
 0x917   :  { %v358_v7 = vadd.f32 %v357_v5, %v156_v1  ;;  %v166_v1 = vadd.f32 %v739_v10, %v165_v61 }
 0x919   :  { %v364_v11 = vadd.f32 %v363_v6, %v358_v7 }
 0x91b   :  { %v571_v12 = vmul.f32 -1.442695, %v364_v11 }
 0x91d   :  { %646 = vpow2.f32 %v571_v12 }
 0x91e   :  { %648 = vtanh.f32 %v364_v11 }
 0x927   :  { %v647_v13 = vpop.eup %646 }
 0x928   :  { %v368_v14 = vadd.f32 1.0, %v647_v13  ;;  %v649_v15 = vpop.eup %648 }
 0x92a   :  { %650 = vrcp.f32 %v368_v14 }
 0x934   :  { %v651_v17 = vpop.eup %650 }
 0x935   :  { %v372_v19 = vsel %vm192_vm2, %v651_v17, %v649_v15  ;;  %v188_v17 = vld [vmem:[%s970_s5 + $0x30] sm:$0xff] }
 0x936   :  { %v373_v20 = vmul.f32 %v372_v19, %v178_v16 }
 0x938   :  { %v374_v22 = vadd.f32 %v373_v20, %v186_v18 }
 0x93a   :  { %377 = vrot.lane.b32.xlu0 %v374_v22, %s678_s8  ;;  %v375_v25 = vmul.f32 %v374_v22, %v345_v59 }
 0x9ac   :  { %v378_v23 = vpop.permute.xlu0 %377 }
 0x9ad   :  { %v380_v24 = vmul.f32 %v378_v23, %v374_v22 }
 0x9af   :  { %382 = vrot.lane.b32.xlu1 %v380_v24, %s679_s9 }
 0xa21   :  { %v383_v26 = vpop.permute.xlu1 %382 }
 0xa22   :  { %v385_v27 = vadd.f32 %v383_v26, %v375_v25 }
 0xa24   :  { %652 = vtanh.f32 %v385_v27 }
 0xa2e   :  { %v653_v28 = vpop.eup %652 }
 0xa2f   :  { %388 = vrot.lane.b32.xlu0 %v653_v28, %s682_s10 }
 0xaa1   :  { %v389_v29 = vpop.permute.xlu0 %388 }
 0xaa2   :  { %v852_v30 = vmul.f32 %v389_v29, %v374_v22 }
 0xaa4   :  { %400 = vperm.xlu0 %610, %v852_v30   ;;  %394 = vperm.xlu1 %609, %v852_v30  }
 0xb23   :  { %v401_v31 = vpop.permute.xlu0 %400  ;;  %v395_v33 = vpop.permute.xlu1 %394 }
 0xb24   :  { %v397_v37 = vmul.f32 %v395_v33, %v732_v8  ;;  %v403_v39 = vmul.f32 %v401_v31, %v734_v9 }
 0xb26   :  { %v398_v40 = vadd.f32 %v397_v37, %v161_v36  ;;  %v171_v36 = vadd.f32 %v597_v60, %v739_v10 }
 0xb28   :  { %v404_v41 = vadd.f32 %v403_v39, %v398_v40 }
 0xb2a   :  { %v572_v42 = vmul.f32 -1.442695, %v404_v41 }
 0xb2c   :  { %654 = vpow2.f32 %v572_v42 }
 0xb2d   :  { %656 = vtanh.f32 %v404_v41 }
 0xb36   :  { %v655_v43 = vpop.eup %654 }
 0xb37   :  { %v408_v44 = vadd.f32 1.0, %v655_v43  ;;  %v657_v45 = vpop.eup %656 }
 0xb39   :  { %658 = vrcp.f32 %v408_v44 }
 0xb43   :  { %v659_v47 = vpop.eup %658 }
 0xb44   :  { %v412_v49 = vsel %vm192_vm2, %v659_v47, %v657_v45 }
 0xb45   :  { %v413_v50 = vmul.f32 %v412_v49, %v179_v46 }
 0xb47   :  { %v414_v51 = vadd.f32 %v413_v50, %v187_v48 }
 0xb49   :  { %417 = vrot.lane.b32.xlu1 %v414_v51, %s678_s8  ;;  %v415_v56 = vmul.f32 %v414_v51, %v385_v27 }
 0xbbb   :  { %v418_v52 = vpop.permute.xlu1 %417 }
 0xbbc   :  { %v420_v53 = vmul.f32 %v418_v52, %v414_v51 }
 0xbbe   :  { %422 = vrot.lane.b32.xlu1 %v420_v53, %s679_s9 }
 0xc30   :  { %v423_v57 = vpop.permute.xlu1 %422 }
 0xc31   :  { %v425_v58 = vadd.f32 %v423_v57, %v415_v56 }
 0xc33   :  { %660 = vtanh.f32 %v425_v58 }
 0xc3d   :  { %v661_v59 = vpop.eup %660 }
 0xc3e   :  { %428 = vrot.lane.b32.xlu0 %v661_v59, %s682_s10 }
 0xcb0   :  { %v429_v62 = vpop.permute.xlu0 %428 }
 0xcb1   :  { %v878_v63 = vmul.f32 %v429_v62, %v414_v51 }
 0xcb3   :  { %440 = vperm.xlu0 %610, %v878_v63   ;;  %434 = vperm.xlu1 %609, %v878_v63  }
 0xcb7   :  { %611 = vset.pattern.permute.xlu0 %v681_v35  ;;  %612 = vset.pattern.permute.xlu1 %v680_v34  ;;  %v180_v35 = vld [vmem:[%s969_s4 + $0x30] sm:$0xff] }
 0xd32   :  { %v441_v2 = vpop.permute.xlu0 %440  ;;  %v435_v4 = vpop.permute.xlu1 %434 }
 0xd33   :  { %v437_v5 = vmul.f32 %v435_v4, %v732_v8  ;;  %v443_v6 = vmul.f32 %v441_v2, %v734_v9 }
 0xd35   :  { %v438_v7 = vadd.f32 %v437_v5, %v166_v1 }
 0xd37   :  { %v444_v11 = vadd.f32 %v443_v6, %v438_v7 }
 0xd39   :  { %v573_v12 = vmul.f32 -1.442695, %v444_v11 }
 0xd3b   :  { %662 = vpow2.f32 %v573_v12 }
 0xd3c   :  { %664 = vtanh.f32 %v444_v11 }
 0xd45   :  { %v663_v13 = vpop.eup %662 }
 0xd46   :  { %v448_v14 = vadd.f32 1.0, %v663_v13  ;;  %v665_v15 = vpop.eup %664 }
 0xd48   :  { %666 = vrcp.f32 %v448_v14 }
 0xd52   :  { %v667_v16 = vpop.eup %666 }
 0xd53   :  { %v452_v18 = vsel %vm192_vm2, %v667_v16, %v665_v15 }
 0xd54   :  { %v453_v19 = vmul.f32 %v452_v18, %v180_v35 }
 0xd56   :  { %v454_v20 = vadd.f32 %v453_v19, %v188_v17 }
 0xd58   :  { %457 = vrot.lane.b32.xlu1 %v454_v20, %s678_s8  ;;  %v455_v24 = vmul.f32 %v454_v20, %v425_v58 }
 0xdca   :  { %v458_v22 = vpop.permute.xlu1 %457 }
 0xdcb   :  { %v460_v23 = vmul.f32 %v458_v22, %v454_v20 }
 0xdcd   :  { %462 = vrot.lane.b32.xlu0 %v460_v23, %s679_s9 }
 0xe3f   :  { %v463_v25 = vpop.permute.xlu0 %462 }
 0xe40   :  { %v465_v26 = vadd.f32 %v463_v25, %v455_v24 }
 0xe42   :  { %668 = vtanh.f32 %v465_v26 }
 0xe4c   :  { %v669_v27 = vpop.eup %668 }
 0xe4d   :  { %468 = vrot.lane.b32.xlu1 %v669_v27, %s682_s10 }
 0xebf   :  { %v469_v28 = vpop.permute.xlu1 %468 }
 0xec0   :  { %v471_v29 = vmul.f32 %v469_v28, %v454_v20 }
 0xec2   :  { %480 = vperm.xlu1 %612, %v471_v29   ;;  %474 = vperm.xlu0 %611, %v471_v29  }
 0xec6   :  { %613 = vset.pattern.permute.xlu0 %v680_v34  ;;  %v181_v34 = vld [vmem:[%s969_s4 + $0x38] sm:$0xff] }
 0xf41   :  { %v481_v31 = vpop.permute.xlu1 %480  ;;  %v475_v33 = vpop.permute.xlu0 %474 }
 0xf42   :  { %v477_v37 = vmul.f32 %v475_v33, %v732_v8  ;;  %v483_v39 = vmul.f32 %v481_v31, %v734_v9  ;;  %v189_v8 = vld [vmem:[%s970_s5 + $0x38] sm:$0xff] }
 0xf44   :  { %v478_v40 = vadd.f32 %v477_v37, %v171_v36 }
 0xf46   :  { %v484_v41 = vadd.f32 %v483_v39, %v478_v40 }
 0xf48   :  { %v574_v42 = vmul.f32 -1.442695, %v484_v41 }
 0xf4a   :  { %670 = vpow2.f32 %v574_v42 }
 0xf4b   :  { %672 = vtanh.f32 %v484_v41 }
 0xf54   :  { %v671_v43 = vpop.eup %670 }
 0xf55   :  { %v488_v44 = vadd.f32 1.0, %v671_v43  ;;  %v673_v45 = vpop.eup %672 }
 0xf57   :  { %674 = vrcp.f32 %v488_v44 }
 0xf61   :  { %v675_v46 = vpop.eup %674 }
 0xf62   :  { %v492_v9 = vsel %vm192_vm2, %v675_v46, %v673_v45 }
 0xf63   :  { %v493_v10 = vmul.f32 %v492_v9, %v181_v34 }
 0xf65   :  { %v494_v47 = vadd.f32 %v493_v10, %v189_v8 }
 0xf67   :  { %497 = vrot.lane.b32.xlu1 %v494_v47, %s678_s8  ;;  %v495_v50 = vmul.f32 %v494_v47, %v465_v26 }
 0xfd9   :  { %v498_v48 = vpop.permute.xlu1 %497 }
 0xfda   :  { %v500_v49 = vmul.f32 %v498_v48, %v494_v47 }
 0xfdc   :  { %502 = vrot.lane.b32.xlu0 %v500_v49, %s679_s9 }
0x104e   :  { %v503_v51 = vpop.permute.xlu0 %502 }
0x104f   :  { %v505_v52 = vadd.f32 %v503_v51, %v495_v50 }
0x1051   :  { %676 = vtanh.f32 %v505_v52  ;;  %513 = vrot.lane.b32.xlu0 %v505_v52, %s682_s10 }
0x1055   :  { %518 = vrot.lane.b32.xlu0 %v786_v3, %s678_s8 }
0x1059   :  { %522 = vrot.lane.b32.xlu0 %v832_v0, %s678_s8 }
0x105b   :  { %v677_v21 = vpop.eup %676 }
0x105c   :  { %508 = vrot.lane.b32.xlu1 %v677_v21, %s682_s10 }
0x105d   :  { %526 = vrot.lane.b32.xlu0 %v878_v63, %s678_s8 }
0x1060   :  { %516 = vrot.lane.b32.xlu1 %v760_v38, %s678_s8 }
0x1064   :  { %520 = vrot.lane.b32.xlu1 %v806_v32, %s678_s8 }
0x1068   :  { %524 = vrot.lane.b32.xlu1 %v852_v30, %s678_s8 }
0x106c   :  { %528 = vrot.lane.b32.xlu1 %v471_v29, %s678_s8 }
0x10c3   :  { %v514_v3 = vpop.permute.xlu0 %513 }
0x10c4   :  { %532 = vrot.lane.b32.xlu1 %v514_v3, %s678_s8 }
0x10c7   :  { %v519_v0 = vpop.permute.xlu0 %518 }
0x10c8   :  { %545 = vst.msk [vmem:[%s971_s6 + $0x8] sm:$0xff] %vm543_vm3, %v519_v0 }
0x10cb   :  { %v523_v53 = vpop.permute.xlu0 %522 }
0x10cc   :  { %547 = vst.msk [vmem:[%s971_s6 + $0x18] sm:$0xff] %vm543_vm3, %v523_v53 }
0x10ce   :  { %v509_v38 = vpop.permute.xlu1 %508 }
0x10cf   :  { %v511_v32 = vmul.f32 %v509_v38, %v494_v47  ;;  %v527_v30 = vpop.permute.xlu0 %526 }
0x10d0   :  { %549 = vst.msk [vmem:[%s971_s6 + $0x28] sm:$0xff] %vm543_vm3, %v527_v30 }
0x10d1   :  { %530 = vrot.lane.b32.xlu0 %v511_v32, %s678_s8 }
0x10d2   :  { %v517_v54 = vpop.permute.xlu1 %516 }
0x10d3   :  { %544 = vst.msk [vmem:[%s971_s6] sm:$0xff] %vm543_vm3, %v517_v54 }
0x10d6   :  { %v521_v55 = vpop.permute.xlu1 %520 }
0x10d7   :  { %546 = vst.msk [vmem:[%s971_s6 + $0x10] sm:$0xff] %vm543_vm3, %v521_v55 }
0x10da   :  { %v525_v56 = vpop.permute.xlu1 %524 }
0x10db   :  { %548 = vst.msk [vmem:[%s971_s6 + $0x20] sm:$0xff] %vm543_vm3, %v525_v56 }
0x10de   :  { %v529_v57 = vpop.permute.xlu1 %528 }
0x10df   :  { %550 = vst.msk [vmem:[%s971_s6 + $0x30] sm:$0xff] %vm543_vm3, %v529_v57 }
0x1136   :  { %v533_v58 = vpop.permute.xlu1 %532 }
0x1137   :  { %552 = vst.msk [vmem:[%s971_s6 + $0x40] sm:$0xff] %vm543_vm3, %v533_v58 }
0x1143   :  { %v531_v59 = vpop.permute.xlu0 %530 }
0x1144   :  { %551 = vst.msk [vmem:[%s971_s6 + $0x38] sm:$0xff] %vm543_vm3, %v531_v59 }

</bundles_post_ra>
